<compile_context>
chip_gen: v7x
topology: tpu7x:2x2x1
jax: 0.10.0
libtpu: 0.0.40
codegen_flags: <defaults>
</compile_context>

<pallas_src>
import functools

import jax
import jax.numpy as jnp
from jax import lax
from jax.experimental import pallas as pl
from jax.experimental.pallas import tpu as pltpu


def _round_up(x: int, m: int) -> int:
    return ((x + m - 1) // m) * m


def _plastic_seq_kernel(homogenous, total_steps, chunk,
                        eta_ref, alpha_ref, inp_ref, yin0_ref, hebb0_hbm,
                        w_hbm, yout_ref, hebb_ref, y_sc, w_vmem, *rest):
    """One grid step == one chunk of `chunk` recurrent time steps.

    State carried across grid steps (never touches HBM mid-episode):
      y_sc     (1, Np)  VMEM scratch        : activation y_t
      hebb_ref (Np, Np) resident out block  : Hebbian trace (constant index map)
      w_vmem   (Np, Np) VMEM scratch        : weights, DMA'd once at chunk 0
    """
    if homogenous:
        (sems,) = rest
        alpha_vmem = None
    else:
        alpha_vmem, sems = rest

    c = pl.program_id(0)
    eta = eta_ref[0, 0]

    @pl.when(c == 0)
    def _init():
        # One-time loads: initial activation, initial trace and the
        # single-buffered weight (and per-synapse alpha) copies.
        y_sc[...] = yin0_ref[...]
        copies = [pltpu.make_async_copy(hebb0_hbm, hebb_ref, sems.at[0]),
                  pltpu.make_async_copy(w_hbm, w_vmem, sems.at[1])]
        if not homogenous:
            copies.append(
                pltpu.make_async_copy(alpha_ref, alpha_vmem, sems.at[2]))
        for cp in copies:
            cp.start()
        for cp in copies:
            cp.wait()

    if homogenous:
        alpha = alpha_ref[0, 0]

    def step(i, y):
        inp = inp_ref[pl.ds(i, 1), :]                 # (1, Np) this step's input
        hebb = hebb_ref[...]                          # (Np, Np)
        if homogenous:
            # Scalar alpha: yin @ (w + a*hebb) == yin@w + a*(yin@hebb); never
            # materialize the N x N weff temporary.
            pre = (jnp.dot(y, w_vmem[...], preferred_element_type=jnp.float32)
                   + alpha * jnp.dot(y, hebb,
                                     preferred_element_type=jnp.float32))
        else:
            # Per-synapse alpha: no algebraic shortcut.
            weff = w_vmem[...] + alpha_vmem[...] * hebb
            pre = jnp.dot(y, weff, preferred_element_type=jnp.float32)

        # clamp blend: take the input on clamped lanes (input != 0), tanh else.
        yout = jnp.where(inp != 0.0, inp, jnp.tanh(pre))
        yout_ref[pl.ds(i, 1), :] = yout

        # Rank-1 Hebbian update on the VPU: (Np,1) column x (1,Np) row
        # broadcast FMA (no K=1 MXU matmul, no extra N^2 temporary pass).
        y_col = jnp.transpose(y)                      # small relayout (Np, 1)
        hebb_ref[...] = (1.0 - eta) * hebb + (eta * y_col) * yout
        return yout

    # Clamp the loop bound so padded time steps in the last chunk never run.
    steps = jnp.minimum(chunk, total_steps - c * chunk)
    y_sc[...] = lax.fori_loop(0, steps, step, y_sc[...])


def plastic_forward(inputs, yin0, hebb0, w, alpha, eta, *, time_chunk=None):
    """Run T recurrent steps of Network.forward in one pallas_call.

    inputs: (T, 1, N) or (T, N); yin0: (1, N); hebb0, w: (N, N);
    alpha: scalar/(1,) (homogenous) or (N, N); eta: scalar/(1,).
    Returns (youts (T, 1, N), hebb_T (N, N)).
    """
    inputs = jnp.asarray(inputs, jnp.float32)
    if inputs.ndim == 2:
        inputs = inputs[:, None, :]
    T, _, N = inputs.shape

    Np = _round_up(N, 128)                       # lane-dense everything
    if time_chunk is None:
        time_chunk = min(128, _round_up(T, 8))
    Tc = max(8, _round_up(int(time_chunk), 8))   # sublane-dense time chunks
    Tp = _round_up(T, Tc)
    n_chunks = Tp // Tc
    pad_n = Np - N

    # Zero padding keeps the recurrence exact: padded lanes of y/hebb/w stay 0.
    inp2d = jnp.pad(inputs[:, 0, :], ((0, Tp - T), (0, pad_n)))        # (Tp, Np)
    yin0_p = jnp.pad(jnp.asarray(yin0, jnp.float32).reshape(1, N),
                     ((0, 0), (0, pad_n)))
    hebb0_p = jnp.pad(jnp.asarray(hebb0, jnp.float32).reshape(N, N),
                      ((0, pad_n), (0, pad_n)))
    w_p = jnp.pad(jnp.asarray(w, jnp.float32).reshape(N, N),
                  ((0, pad_n), (0, pad_n)))
    eta_s = jnp.asarray(eta, jnp.float32).reshape(1, 1)

    alpha = jnp.asarray(alpha, jnp.float32)
    homogenous = alpha.size == 1
    if homogenous:
        alpha_x = alpha.reshape(1, 1)                          # scalar -> SMEM
        alpha_spec = pl.BlockSpec(memory_space=pltpu.MemorySpace.SMEM)
    else:
        alpha_x = jnp.pad(alpha.reshape(N, N), ((0, pad_n), (0, pad_n)))
        alpha_spec = pl.BlockSpec(memory_space=pl.ANY)         # DMA'd once

    scratch_shapes = [pltpu.VMEM((1, Np), jnp.float32),        # carried y_t
                      pltpu.VMEM((Np, Np), jnp.float32)]       # w (1 buffer)
    if not homogenous:
        scratch_shapes.append(pltpu.VMEM((Np, Np), jnp.float32))   # alpha
    scratch_shapes.append(pltpu.SemaphoreType.DMA((3,)))

    # Per-buffer VMEM accounting: single-buffered N^2 scratches, conservatively
    # 2x for the resident hebb output block and the streamed (Tc, Np) chunks.
    nn = 4 * Np * Np
    needed = (nn * (1 + (0 if homogenous else 1))     # w_vmem (+ alpha_vmem)
              + 2 * nn                                # hebb output block
              + 2 * 2 * (Tc * Np * 4)                 # in/out chunks, 2-deep
              + 16 * Np)                              # small carries
    compiler_kwargs = {}
    if needed > 12 * 1024 * 1024:
        try:
            vmem_cap = int(pltpu.get_tpu_info().vmem_capacity_bytes)
        except Exception:
            vmem_cap = 64 * 1024 * 1024               # conservative (v7x)
        compiler_kwargs["vmem_limit_bytes"] = int(
            min(needed + (8 << 20), vmem_cap - (2 << 20)))

    kernel = functools.partial(_plastic_seq_kernel, homogenous, T, Tc)

    youts2d, hebb_p = pl.pallas_call(
        kernel,
        out_shape=(jax.ShapeDtypeStruct((Tp, Np), jnp.float32),
                   jax.ShapeDtypeStruct((Np, Np), jnp.float32)),
        grid=(n_chunks,),
        in_specs=[
            pl.BlockSpec(memory_space=pltpu.MemorySpace.SMEM),   # eta (1,1)
            alpha_spec,                                          # alpha
            pl.BlockSpec((Tc, Np), lambda c: (c, 0)),            # input chunk
            pl.BlockSpec((1, Np), lambda c: (0, 0)),             # yin0
            pl.BlockSpec(memory_space=pl.ANY),                   # hebb0 (HBM)
            pl.BlockSpec(memory_space=pl.ANY),                   # w (HBM)
        ],
        out_specs=(
            pl.BlockSpec((Tc, Np), lambda c: (c, 0)),            # yout chunk
            pl.BlockSpec((Np, Np), lambda c: (0, 0)),            # hebb (resident)
        ),
        scratch_shapes=scratch_shapes,
        compiler_params=pltpu.CompilerParams(
            dimension_semantics=("arbitrary",), **compiler_kwargs),
    )(eta_s, alpha_x, inp2d, yin0_p, hebb0_p, w_p)

    youts = youts2d[:T, :N].reshape(T, 1, N)
    return youts, hebb_p[:N, :N]


def plastic_step(inp, yin, hebb, w, alpha, eta):
    """Single forward step with the exact Network.forward signature."""
    youts, hebb_new = plastic_forward(jnp.asarray(inp, jnp.float32)[None],
                                      yin, hebb, w, alpha, eta)
    return youts[0], hebb_new


def _reference_forward(inputs, yin, hebb, w, alpha, eta):
    """Pure-JAX unrolled reference of the PyTorch forward (per-step loop)."""
    alpha = jnp.asarray(alpha, jnp.float32)
    eta = jnp.asarray(eta, jnp.float32).reshape(())
    youts = []
    for t in range(inputs.shape[0]):
        inp = inputs[t]                                       # (1, N)
        clamps = (inp != 0.0).astype(jnp.float32)
        yout = jnp.tanh(yin @ (w + alpha * hebb)) * (1.0 - clamps) + inp * clamps
        hebb = (1.0 - eta) * hebb + eta * (yin.T @ yout)
        yin = yout
        youts.append(yout)
    return jnp.stack(youts), hebb


if __name__ == "__main__":
    key = jax.random.PRNGKey(0)
    k_w, k_a, k_pat, k_mask = jax.random.split(key, 4)

    N = 128                                # params['nbneur']
    T = 8                                  # episode length (recurrent steps)

    # Deterministic parameter init (matches __init__ shapes).
    w = 0.01 * jax.random.normal(k_w, (N, N), jnp.float32)
    alpha_h = 0.01 * jnp.ones((1,), jnp.float32)                   # homogenous
    alpha_m = 0.01 * jax.random.normal(k_a, (N, N), jnp.float32)   # per-synapse
    eta = 0.01 * jnp.ones((1,), jnp.float32)

    # Binary pattern clamped on half the neurons for the first half of the
    # episode, free-running (zero input) afterwards.
    pattern = jnp.sign(jax.random.normal(k_pat, (1, N), jnp.float32))
    mask = (jax.random.uniform(k_mask, (1, N)) < 0.5).astype(jnp.float32)
    clamped = pattern * mask
    inputs = jnp.concatenate(
        [jnp.tile(clamped[None], (T // 2, 1, 1)),
         jnp.zeros((T - T // 2, 1, N), jnp.float32)], axis=0)      # (T, 1, N)

    # initialZeroState / initialZeroHebb
    yin0 = jnp.zeros((1, N), jnp.float32)
    hebb0 = jnp.zeros((N, N), jnp.float32)

    # --- homogenous (scalar alpha) path ------------------------------------
    youts, hebb_T = plastic_forward(inputs, yin0, hebb0, w, alpha_h, eta)
    jax.block_until_ready((youts, hebb_T))
    ref_y, ref_h = _reference_forward(inputs, yin0, hebb0, w, alpha_h, eta)
    assert jnp.allclose(youts, ref_y, atol=1e-4, rtol=1e-4)
    assert jnp.allclose(hebb_T, ref_h, atol=1e-4, rtol=1e-4)

    # --- per-synapse alpha path (homogenous == 0 branch) --------------------
    youts2, hebb_T2 = plastic_forward(inputs, yin0, hebb0, w, alpha_m, eta)
    jax.block_until_ready((youts2, hebb_T2))
    ref_y2, ref_h2 = _reference_forward(inputs, yin0, hebb0, w, alpha_m, eta)
    assert jnp.allclose(youts2, ref_y2, atol=1e-4, rtol=1e-4)
    assert jnp.allclose(hebb_T2, ref_h2, atol=1e-4, rtol=1e-4)

    # --- ragged shapes: exercise the N-padding and T-padding paths ----------
    N2, T2 = 96, 5
    k_w2, k_p2 = jax.random.split(k_w)
    w2 = 0.01 * jax.random.normal(k_w2, (N2, N2), jnp.float32)
    pat2 = jnp.sign(jax.random.normal(k_p2, (1, N2), jnp.float32))
    inputs2 = jnp.concatenate([jnp.tile(pat2[None], (2, 1, 1)),
                               jnp.zeros((T2 - 2, 1, N2), jnp.float32)], axis=0)
    y0_2 = jnp.zeros((1, N2), jnp.float32)
    h0_2 = jnp.zeros((N2, N2), jnp.float32)
    y3, h3 = plastic_forward(inputs2, y0_2, h0_2, w2, alpha_h, eta)
    jax.block_until_ready((y3, h3))
    ry3, rh3 = _reference_forward(inputs2, y0_2, h0_2, w2, alpha_h, eta)
    assert jnp.allclose(y3, ry3, atol=1e-4, rtol=1e-4)
    assert jnp.allclose(h3, rh3, atol=1e-4, rtol=1e-4)

    # --- single-step wrapper (exact Network.forward call shape) -------------
    y1, h1 = plastic_step(clamped, yin0, hebb0, w, alpha_h, eta)
    jax.block_until_ready((y1, h1))

    print("KERNEL_OK")
</pallas_src>

<mosaic_0001>
module attributes {stable_mosaic.version = 11 : i64} {
  func.func @_plastic_seq_kernel(%arg0: i32, %arg1: memref<1x1xf32, #tpu.memory_space<smem>>, %arg2: memref<1x1xf32, #tpu.memory_space<smem>>, %arg3: memref<8x128xf32, #tpu.memory_space<vmem>>, %arg4: memref<1x128xf32, #tpu.memory_space<vmem>>, %arg5: memref<128x128xf32, #tpu.memory_space<any>>, %arg6: memref<128x128xf32, #tpu.memory_space<any>>, %arg7: memref<8x128xf32, #tpu.memory_space<vmem>>, %arg8: memref<128x128xf32, #tpu.memory_space<vmem>>, %arg9: memref<1x128xf32, #tpu.memory_space<vmem>>, %arg10: memref<128x128xf32, #tpu.memory_space<vmem>>, %arg11: memref<3x!tpu.dma_semaphore, #tpu.memory_space<semaphore_mem>>) attributes {dimension_semantics = [#tpu.dimension_semantics<arbitrary>], iteration_bounds = array<i64: 1>, scalar_prefetch = 0 : i64, scratch_operands = 3 : i64, tpu.core_type = #tpu.core_type<tc>, window_params = [{transform_indices = @transform_0, window_bounds = array<i64: 1, 1>}, {transform_indices = @transform_1, window_bounds = array<i64: 1, 1>}, {transform_indices = @transform_2, window_bounds = array<i64: 8, 128>}, {pipeline_mode = #tpu.pipeline_mode<synchronous>, transform_indices = @transform_3, window_bounds = array<i64: 1, 128>}, {}, {}, {transform_indices = @transform_6, window_bounds = array<i64: 8, 128>}, {pipeline_mode = #tpu.pipeline_mode<synchronous>, transform_indices = @transform_7, window_bounds = array<i64: 128, 128>}]} {
    %c0 = arith.constant 0 : index
    %c0_0 = arith.constant 0 : index
    %0 = memref.load %arg1[%c0, %c0_0] : memref<1x1xf32, #tpu.memory_space<smem>>
    %c0_i32 = arith.constant 0 : i32
    %1 = arith.cmpi eq, %arg0, %c0_i32 : i32
    %2 = arith.extui %1 : i1 to i32
    %c0_i32_1 = arith.constant 0 : i32
    %3 = arith.cmpi ne, %2, %c0_i32_1 : i32
    scf.if %3 {
      %c0_11 = arith.constant 0 : index
      %c0_12 = arith.constant 0 : index
      %13 = vector.load %arg4[%c0_11, %c0_12] : memref<1x128xf32, #tpu.memory_space<vmem>>, vector<1x128xf32>
      %c0_13 = arith.constant 0 : index
      %c0_14 = arith.constant 0 : index
      %14 = vector.load %arg9[%c0_13, %c0_14] : memref<1x128xf32, #tpu.memory_space<vmem>>, vector<1x128xf32>
      tpu.vector_store %arg9[%c0_13, %c0_14], %13 {strides = array<i32>} : memref<1x128xf32, #tpu.memory_space<vmem>>, vector<1x128xf32>,
      %c0_i32_15 = arith.constant 0 : i32
      %15 = tpu.memref_slice %arg11[%c0_i32_15] : memref<3x!tpu.dma_semaphore, #tpu.memory_space<semaphore_mem>> -> memref<1x!tpu.dma_semaphore, #tpu.memory_space<semaphore_mem>>
      %16 = tpu.memref_squeeze %15 : memref<1x!tpu.dma_semaphore, #tpu.memory_space<semaphore_mem>> -> memref<!tpu.dma_semaphore, #tpu.memory_space<semaphore_mem>>
      tpu.enqueue_dma source(%arg5 : memref<128x128xf32, #tpu.memory_space<any>>) target(%arg8 : memref<128x128xf32, #tpu.memory_space<vmem>>) target_semaphore(%16 : memref<!tpu.dma_semaphore, #tpu.memory_space<semaphore_mem>>)
      %c1_i32_16 = arith.constant 1 : i32
      %17 = tpu.memref_slice %arg11[%c1_i32_16] : memref<3x!tpu.dma_semaphore, #tpu.memory_space<semaphore_mem>> -> memref<1x!tpu.dma_semaphore, #tpu.memory_space<semaphore_mem>>
      %18 = tpu.memref_squeeze %17 : memref<1x!tpu.dma_semaphore, #tpu.memory_space<semaphore_mem>> -> memref<!tpu.dma_semaphore, #tpu.memory_space<semaphore_mem>>
      tpu.enqueue_dma source(%arg6 : memref<128x128xf32, #tpu.memory_space<any>>) target(%arg10 : memref<128x128xf32, #tpu.memory_space<vmem>>) target_semaphore(%18 : memref<!tpu.dma_semaphore, #tpu.memory_space<semaphore_mem>>)
      %c0_i32_17 = arith.constant 0 : i32
      %19 = tpu.memref_slice %arg11[%c0_i32_17] : memref<3x!tpu.dma_semaphore, #tpu.memory_space<semaphore_mem>> -> memref<1x!tpu.dma_semaphore, #tpu.memory_space<semaphore_mem>>
      %20 = tpu.memref_squeeze %19 : memref<1x!tpu.dma_semaphore, #tpu.memory_space<semaphore_mem>> -> memref<!tpu.dma_semaphore, #tpu.memory_space<semaphore_mem>>
      tpu.wait_dma2 semaphore(%20 : memref<!tpu.dma_semaphore, #tpu.memory_space<semaphore_mem>>) src(%arg5 : memref<128x128xf32, #tpu.memory_space<any>>) dst(%arg8 : memref<128x128xf32, #tpu.memory_space<vmem>>)
      %c1_i32_18 = arith.constant 1 : i32
      %21 = tpu.memref_slice %arg11[%c1_i32_18] : memref<3x!tpu.dma_semaphore, #tpu.memory_space<semaphore_mem>> -> memref<1x!tpu.dma_semaphore, #tpu.memory_space<semaphore_mem>>
      %22 = tpu.memref_squeeze %21 : memref<1x!tpu.dma_semaphore, #tpu.memory_space<semaphore_mem>> -> memref<!tpu.dma_semaphore, #tpu.memory_space<semaphore_mem>>
      tpu.wait_dma2 semaphore(%22 : memref<!tpu.dma_semaphore, #tpu.memory_space<semaphore_mem>>) src(%arg6 : memref<128x128xf32, #tpu.memory_space<any>>) dst(%arg10 : memref<128x128xf32, #tpu.memory_space<vmem>>)
    } else {
    }
    %c0_2 = arith.constant 0 : index
    %c0_3 = arith.constant 0 : index
    %4 = memref.load %arg2[%c0_2, %c0_3] : memref<1x1xf32, #tpu.memory_space<smem>>
    %c8_i32 = arith.constant 8 : i32
    %5 = arith.muli %arg0, %c8_i32 : i32
    %c8_i32_4 = arith.constant 8 : i32
    %6 = arith.subi %c8_i32_4, %5 : i32
    %c8_i32_5 = arith.constant 8 : i32
    %7 = arith.minsi %c8_i32_5, %6 : i32
    %c0_6 = arith.constant 0 : index
    %c0_7 = arith.constant 0 : index
    %8 = vector.load %arg9[%c0_6, %c0_7] : memref<1x128xf32, #tpu.memory_space<vmem>>, vector<1x128xf32>
    %c0_i32_8 = arith.constant 0 : i32
    %9 = arith.subi %7, %c0_i32_8 : i32
    %10 = arith.addi %c0_i32_8, %9 : i32
    %c1_i32 = arith.constant 1 : i32
    %11 = scf.for %arg12 = %c0_i32_8 to %10 step %c1_i32 iter_args(%arg13 = %8) -> (vector<1x128xf32>)  : i32 {
      %13 = arith.index_cast %arg12 : i32 to index
      %c0_11 = arith.constant 0 : index
      %14 = vector.load %arg3[%13, %c0_11] : memref<8x128xf32, #tpu.memory_space<vmem>>, vector<1x128xf32>
      %c0_12 = arith.constant 0 : index
      %c0_13 = arith.constant 0 : index
      %15 = vector.load %arg8[%c0_12, %c0_13] : memref<128x128xf32, #tpu.memory_space<vmem>>, vector<128x128xf32>
      %c0_14 = arith.constant 0 : index
      %c0_15 = arith.constant 0 : index
      %16 = vector.load %arg10[%c0_14, %c0_15] : memref<128x128xf32, #tpu.memory_space<vmem>>, vector<128x128xf32>
      %cst = arith.constant dense<0.000000e+00> : vector<1x128xf32>
      %17 = tpu.matmul %arg13, %16, %cst {dimension_numbers = #tpu.dot_dimension_numbers<[1], [0], [0], [1], [0, 0, 1, 1], [], []>} : vector<1x128xf32>, vector<128x128xf32>, vector<1x128xf32> -> vector<1x128xf32>
      %cst_16 = arith.constant dense<0.000000e+00> : vector<1x128xf32>
      %18 = tpu.matmul %arg13, %15, %cst_16 {dimension_numbers = #tpu.dot_dimension_numbers<[1], [0], [0], [1], [0, 0, 1, 1], [], []>} : vector<1x128xf32>, vector<128x128xf32>, vector<1x128xf32> -> vector<1x128xf32>
      %19 = vector.broadcast %4 : f32 to vector<1x128xf32>
      %20 = arith.mulf %19, %18 : vector<1x128xf32>
      %21 = arith.addf %17, %20 : vector<1x128xf32>
      %cst_17 = arith.constant 0.000000e+00 : f32
      %22 = vector.broadcast %cst_17 : f32 to vector<1x128xf32>
      %23 = arith.cmpf one, %14, %22 : vector<1x128xf32>
      %24 = math.tanh %21 : vector<1x128xf32>
      %25 = arith.select %23, %14, %24 : vector<1x128xi1>, vector<1x128xf32>
      %26 = arith.index_cast %arg12 : i32 to index
      %c0_18 = arith.constant 0 : index
      %27 = vector.load %arg7[%26, %c0_18] : memref<8x128xf32, #tpu.memory_space<vmem>>, vector<1x128xf32>
      tpu.vector_store %arg7[%26, %c0_18], %25 {strides = array<i32>} : memref<8x128xf32, #tpu.memory_space<vmem>>, vector<1x128xf32>,
      %28 = tpu.transpose %arg13, [1, 0] : vector<1x128xf32> -> vector<128x1xf32>
      %cst_19 = arith.constant 1.000000e+00 : f32
      %29 = arith.subf %cst_19, %0 : f32
      %30 = vector.broadcast %29 : f32 to vector<128x128xf32>
      %31 = arith.mulf %30, %15 : vector<128x128xf32>
      %32 = vector.broadcast %0 : f32 to vector<128x1xf32>
      %33 = arith.mulf %32, %28 : vector<128x1xf32>
      %34 = vector.broadcast %33 : vector<128x1xf32> to vector<128x128xf32>
      %35 = vector.broadcast %25 : vector<1x128xf32> to vector<128x128xf32>
      %36 = arith.mulf %34, %35 : vector<128x128xf32>
      %37 = arith.addf %31, %36 : vector<128x128xf32>
      %c0_20 = arith.constant 0 : index
      %c0_21 = arith.constant 0 : index
      %38 = vector.load %arg8[%c0_20, %c0_21] : memref<128x128xf32, #tpu.memory_space<vmem>>, vector<128x128xf32>
      tpu.vector_store %arg8[%c0_20, %c0_21], %37 {strides = array<i32>} : memref<128x128xf32, #tpu.memory_space<vmem>>, vector<128x128xf32>,
      scf.yield %25 : vector<1x128xf32>
    }
    %c0_9 = arith.constant 0 : index
    %c0_10 = arith.constant 0 : index
    %12 = vector.load %arg9[%c0_9, %c0_10] : memref<1x128xf32, #tpu.memory_space<vmem>>, vector<1x128xf32>
    tpu.vector_store %arg9[%c0_9, %c0_10], %11 {strides = array<i32>} : memref<1x128xf32, #tpu.memory_space<vmem>>, vector<1x128xf32>,
    return
  }
  func.func @transform_0(%arg0: i32) -> (i32, i32) {
    %c0_i32 = arith.constant 0 : i32
    %c0_i32_0 = arith.constant 0 : i32
    %c0_i32_1 = arith.constant 0 : i32
    return %c0_i32, %c0_i32_0 : i32, i32
  }
  func.func @transform_1(%arg0: i32) -> (i32, i32) {
    %c0_i32 = arith.constant 0 : i32
    %c0_i32_0 = arith.constant 0 : i32
    %c0_i32_1 = arith.constant 0 : i32
    return %c0_i32, %c0_i32_0 : i32, i32
  }
  func.func @transform_2(%arg0: i32) -> (i32, i32) {
    %c0_i32 = arith.constant 0 : i32
    %c0_i32_0 = arith.constant 0 : i32
    return %arg0, %c0_i32 : i32, i32
  }
  func.func @transform_3(%arg0: i32) -> (i32, i32) {
    %c0_i32 = arith.constant 0 : i32
    %c0_i32_0 = arith.constant 0 : i32
    %c0_i32_1 = arith.constant 0 : i32
    return %c0_i32, %c0_i32_0 : i32, i32
  }
  func.func @transform_6(%arg0: i32) -> (i32, i32) {
    %c0_i32 = arith.constant 0 : i32
    %c0_i32_0 = arith.constant 0 : i32
    return %arg0, %c0_i32 : i32, i32
  }
  func.func @transform_7(%arg0: i32) -> (i32, i32) {
    %c0_i32 = arith.constant 0 : i32
    %c0_i32_0 = arith.constant 0 : i32
    %c0_i32_1 = arith.constant 0 : i32
    return %c0_i32, %c0_i32_0 : i32, i32
  }
}

</mosaic_0001>

<bundles_post_ra>
// kernel: tpu_custom_call.1
= control target key start
LH: loop header
LB: loop body
LE: loop exit
PB: predicated region body
PF: predicated region fallthrough
CT: control target
= control target key end

     0   :  { %15 = vsyncpa [#allocation8], 0  ;;  %s1128_s0 = inlined_call_operand.<no memory space> [shape: f32[1,1], index: 0, kind: input, shape index: {}]   ;;  %s1129_s1 = inlined_call_operand.<no memory space> [shape: f32[1,1], index: 1, kind: input, shape index: {}]   ;;  %s1130_s2 = inlined_call_operand.hbm [shape: f32[8,128], index: 2, kind: input, shape index: {}]   ;;  %s1131_s3 = inlined_call_operand.vmem [shape: f32[1,128], index: 3, kind: input, shape index: {}]   ;;  %s1132_s4 = inlined_call_operand.hbm [shape: f32[128,128], index: 4, kind: input, shape index: {}]   ;;  %s1133_s5 = inlined_call_operand.hbm [shape: f32[128,128], index: 5, kind: input, shape index: {}]   ;;  %s1134_s6 = inlined_call_operand.hbm [shape: f32[8,128], index: 6, kind: output, shape index: {0}]   ;;  %s1135_s7 = inlined_call_operand.hbm [shape: f32[128,128], index: 7, kind: output, shape index: {1}]  }
   0x1   :  { %16 = vsyncpa [#allocation9], 0 }
   0x2   :  { %17 = vsyncpa [#allocation12], 0  ;;  %s848_s24 = smov [#allocation7]   ;;  %s712_s28 = scalar_lea.hbm %s1130_s2, 128 }
   0x3   :  { %s28_s25 = sshll.u32 %s848_s24, 4  ;;  %p713_p0 = scmp.ne.s32.totalorder %s1130_s2, %s712_s28  ;;  %s29_s25 = int_to_ptr.vmem [resolvable:$true] %s28_s25 }
   0x4   :  { %p716_p1 = scmp.lt.u32.totalorder %s712_s28, %s1130_s2 }
   0x6   :  { %p718_p2 = pnand %p716_p1, %p713_p0 }
   0x8   :  { %721 = shalt.err (!%p718_p2)
}
   0x9   :  { %s722_s10 = scalar_lea.vmem %s29_s25, 128  ;;  %p727_p4 = scmp.lt.s32.totalorder %s29_s25, %s29_s25 }
   0xa   :  { %p723_p3 = scmp.ne.s32.totalorder %s29_s25, %s722_s10  ;;  %p728_p5 = scmp.lt.s32.totalorder %s722_s10, %s722_s10 }
   0xc   :  { %p729_p6 = por %p728_p5, %p727_p4 }
   0xe   :  { %p730_p7 = pnand %p729_p6, %p723_p3 }
  0x10   :  { %733 = shalt.err (!%p730_p7)
}
  0x11   :  { %31 = dma.hbm_to_vmem [thread:$0]  %s1130_s2, 128, %s29_s25, [#allocation8]  }
  0x12   :  { %830 = dma.done.wait [#allocation8], 128  }
  0x13   :  { %831 = vsyncadd [#allocation8], 4294967168  ;;  %s849_s13 = smov [#allocation11]   ;;  %s850_s15 = smov [#allocation3]  }
  0x14   :  { %s51_s14 = sshll.u32 %s849_s13, 4  ;;  %s63_s16 = sshll.u32 %s850_s15, 4  ;;  %s910_s14 = int_to_ptr.vmem [resolvable:$true] %s51_s14  ;;  %s64_s16 = int_to_ptr.vmem [resolvable:$true] %s63_s16 }
  0x15   :  { %s734_s19 = scalar_lea.hbm %s1132_s4, 2048 }
  0x16   :  { %p735_p8 = scmp.ne.s32.totalorder %s1132_s4, %s734_s19  ;;  %p738_p9 = scmp.lt.u32.totalorder %s734_s19, %s1132_s4 }
  0x18   :  { %p740_p10 = pnand %p738_p9, %p735_p8 }
  0x1a   :  { %743 = shalt.err (!%p740_p10)  }
  0x1b   :  { %s744_s2 = scalar_lea.vmem %s910_s14, 2048  ;;  %p749_p12 = scmp.lt.s32.totalorder %s910_s14, %s910_s14 }
  0x1c   :  { %p745_p11 = scmp.ne.s32.totalorder %s910_s14, %s744_s2  ;;  %p750_p13 = scmp.lt.s32.totalorder %s744_s2, %s744_s2 }
  0x1e   :  { %p751_p0 = por %p750_p13, %p749_p12 }
  0x20   :  { %p925_p1 = pnand %p751_p0, %p745_p11 }
  0x22   :  { %755 = shalt.err (!%p925_p1)  }
  0x23   :  { %54 = dma.hbm_to_vmem [thread:$0]  %s1132_s4, 2048, %s910_s14, [#allocation4] }
  0x24   :  { %s756_s29 = scalar_lea.hbm %s1133_s5, 2048 }
  0x25   :  { %p757_p2 = scmp.ne.s32.totalorder %s1133_s5, %s756_s29  ;;  %p760_p3 = scmp.lt.u32.totalorder %s756_s29, %s1133_s5 }
  0x27   :  { %p762_p4 = pnand %p760_p3, %p757_p2 }
  0x29   :  { %765 = shalt.err (!%p762_p4)  }
  0x2a   :  { %s766_s11 = scalar_lea.vmem %s64_s16, 2048  ;;  %p771_p6 = scmp.lt.s32.totalorder %s64_s16, %s64_s16 }
  0x2b   :  { %p767_p5 = scmp.ne.s32.totalorder %s64_s16, %s766_s11  ;;  %p772_p7 = scmp.lt.s32.totalorder %s766_s11, %s766_s11 }
  0x2d   :  { %p773_p8 = por %p772_p7, %p771_p6 }
  0x2f   :  { %p774_p9 = pnand %p773_p8, %p767_p5 }
  0x31   :  { %777 = shalt.err (!%p774_p9)  }
  0x32   :  { %66 = dma.hbm_to_vmem [thread:$0]  %s1133_s5, 2048, %s64_s16, [#allocation4 + $0x1]  ;;  %v42_v0 = vld [vmem:[%s1131_s3] sm:$0x1] }
  0x33   :  { %43 = vst [vmem:[#allocation2] sm:$0x1] %v42_v0 }
  0x34   :  { %832 = dma.done.wait [#allocation4], 2048 }
  0x35   :  { %833 = vsyncadd [#allocation4], 4294965248 }
  0x36   :  { %834 = dma.done.wait [#allocation4 + $0x1], 2048 }
  0x37   :  { %835 = vsyncadd [#allocation4 + $0x1], 4294965248  ;;  %s952_s17 = smov 0  }
  0x3a   :  { %v77_v1 = vld [vmem:[#allocation2] sm:$0x1]  }
  0x3b LB: > { %v960_v2 = vld [vmem:[#allocation11] sm:$0xff]  ;;  %v962_v3 = vld [vmem:[#allocation11 + $0x8] sm:$0xff]  ;;  %v103_v4 = vld [vmem:[#allocation3] sm:$0xff]  ;;  %v851_v5 = vmov 0.0|0.0   ;;  %266 = vxpose.xlu0.b32.start.end [1/1] (short) %v842_v1, 128  ;;  %vm852_vm0 = vmmov 0   ;;  %v853_v13 = vmov 0.0   ;;  %v316_v53 = vstv %s1128_s0  ;;  %s846_s17 = sphi %s952_s17, %s81_s17   ;;  %v842_v1 = vphi %v77_v1, %v1138_v1  }
  0x3c   : > { %634 = vmatprep.subr.bf16.mxu0 %v851_v5  ;;  %v635_v6 = vpack.c.bf16 %v962_v3, %v960_v2  ;;  %658 = vmatprep.subr.bf16.mxu1 %v851_v5  ;;  %v104_v7 = vld [vmem:[#allocation3 + $0x8] sm:$0xff]  ;;  %v968_v8 = vld [vmem:[#allocation11 + $0x10] sm:$0xff]  ;;  %v105_v11 = vld [vmem:[#allocation3 + $0x10] sm:$0xff]  ;;  %v854_v20 = vmov 0   ;;  %s85_s19 = scalar_lea.vmem [#allocation7], %s846_s17  ;;  %s298_s22 = ssub.f32 1.0, %s1128_s0 }
  0x3d   : > { %v970_v9 = vld [vmem:[#allocation11 + $0x18] sm:$0xff]  ;;  %v659_v10 = vpack.c.bf16 %v104_v7, %v103_v4  ;;  %v106_v12 = vld [vmem:[#allocation3 + $0x18] sm:$0xff]  ;;  %596 = vmatprep.mubr.msk.f32.mxu0 %vm852_vm0, %v853_v13  ;;  %631 = vmatprep.mubr.msk.f32.mxu1 %vm852_vm0, %v853_v13  ;;  %v976_v16 = vld [vmem:[#allocation11 + $0x20] sm:$0xff]  ;;  %s264_s23 = scalar_lea.vmem [#allocation10], %s846_s17  ;;  %s81_s17 = sadd.s32 1, %s846_s17  }
  0x3e   : > { %636 = vmatpush3.bf16.msra.mxu0 %v635_v6  ;;  %v638_v14 = vpack.c.bf16 %v970_v9, %v968_v8  ;;  %v662_v15 = vpack.c.bf16 %v106_v12, %v105_v11  ;;  %v978_v17 = vld [vmem:[#allocation11 + $0x28] sm:$0xff]  ;;  %v107_v18 = vld [vmem:[#allocation3 + $0x20] sm:$0xff]  ;;  %v108_v19 = vld [vmem:[#allocation3 + $0x28] sm:$0xff]  ;;  %709 = vset.pattern.permute.xlu1 %v854_v20  ;;  %p80_p10 = scmp.ge.s32.totalorder %s81_s17, 8 }
  0x3f   : > { %660 = vmatpush3.bf16.msra.mxu1 %v659_v10  ;;  %637 = vmatprep.subr.bf16.mxu0 %v851_v5  ;;  %v641_v21 = vpack.c.bf16 %v978_v17, %v976_v16  ;;  %v665_v22 = vpack.c.bf16 %v108_v19, %v107_v18  ;;  %v984_v23 = vld [vmem:[#allocation11 + $0x30] sm:$0xff]  ;;  %v986_v24 = vld [vmem:[#allocation11 + $0x38] sm:$0xff]  ;;  %v109_v25 = vld [vmem:[#allocation3 + $0x30] sm:$0xff]  ;;  %s855_s2 = smov (%p80_p10), [#allocation10]  }
  0x40   : > { %661 = vmatprep.subr.bf16.mxu1 %v851_v5  ;;  %v110_v26 = vld [vmem:[#allocation3 + $0x38] sm:$0xff]  ;;  %v644_v27 = vpack.c.bf16 %v986_v24, %v984_v23  ;;  %v992_v29 = vld [vmem:[#allocation11 + $0x40] sm:$0xff]  ;;  %v111_v31 = vld [vmem:[#allocation3 + $0x40] sm:$0xff]  ;;  %s472_s25 = sshll.u32 (%p80_p10), %s855_s2, 4  ;;  %s473_s25 = int_to_ptr.vmem [resolvable:$true] %s472_s25 }
  0x41   : > { %v668_v28 = vpack.c.bf16 %v110_v26, %v109_v25  ;;  %v994_v30 = vld [vmem:[#allocation11 + $0x48] sm:$0xff]  ;;  %v112_v32 = vld [vmem:[#allocation3 + $0x48] sm:$0xff]  ;;  %v1000_v35 = vld [vmem:[#allocation11 + $0x50] sm:$0xff]  ;;  %s778_s26 = scalar_lea.vmem (%p80_p10), %s473_s25, 128  ;;  %p783_p12 = scmp.lt.s32.totalorder (%p80_p10), %s473_s25, %s473_s25 }
  0x42   : > { %639 = vmatpush3.bf16.msra.mxu0 %v638_v14  ;;  %v647_v33 = vpack.c.bf16 %v994_v30, %v992_v29  ;;  %v671_v34 = vpack.c.bf16 %v112_v32, %v111_v31  ;;  %v1002_v36 = vld [vmem:[#allocation11 + $0x58] sm:$0xff]  ;;  %v113_v37 = vld [vmem:[#allocation3 + $0x50] sm:$0xff]  ;;  %v114_v38 = vld [vmem:[#allocation3 + $0x58] sm:$0xff]  ;;  %v189_v32 = vstv %s1129_s1  ;;  %p779_p11 = scmp.ne.s32.totalorder (%p80_p10), %s473_s25, %s778_s26  ;;  %p784_p13 = scmp.lt.s32.totalorder (%p80_p10), %s778_s26, %s778_s26 }
  0x43   : > { %663 = vmatpush3.bf16.msra.mxu1 %v662_v15  ;;  %640 = vmatprep.subr.bf16.mxu0 %v851_v5  ;;  %v650_v39 = vpack.c.bf16 %v1002_v36, %v1000_v35  ;;  %v674_v40 = vpack.c.bf16 %v114_v38, %v113_v37  ;;  %v1008_v41 = vld [vmem:[#allocation11 + $0x60] sm:$0xff]  ;;  %v1010_v42 = vld [vmem:[#allocation11 + $0x68] sm:$0xff]  ;;  %v115_v43 = vld [vmem:[#allocation3 + $0x60] sm:$0xff] }
  0x44   : > { %664 = vmatprep.subr.bf16.mxu1 %v851_v5  ;;  %v116_v44 = vld [vmem:[#allocation3 + $0x68] sm:$0xff]  ;;  %v653_v45 = vpack.c.bf16 %v1010_v42, %v1008_v41  ;;  %v1016_v47 = vld [vmem:[#allocation11 + $0x70] sm:$0xff]  ;;  %v117_v49 = vld [vmem:[#allocation3 + $0x70] sm:$0xff]  ;;  %p785_p0 = por (%p80_p10), %p784_p13, %p783_p12 }
  0x45   : > { %v677_v46 = vpack.c.bf16 %v116_v44, %v115_v43  ;;  %v1018_v48 = vld [vmem:[#allocation11 + $0x78] sm:$0xff]  ;;  %v118_v50 = vld [vmem:[#allocation3 + $0x78] sm:$0xff]  ;;  %v413_v43 = vlaneseq }
  0x46   : > { %642 = vmatpush3.bf16.msra.mxu0 %v641_v21  ;;  %v656_v51 = vpack.c.bf16 %v1018_v48, %v1016_v47  ;;  %v680_v52 = vpack.c.bf16 %v118_v50, %v117_v49  ;;  %v1037_v49 = vstv %s298_s22  ;;  %p786_p2 = pnand (%p80_p10), %p785_p0, %p779_p11 }
  0x47   : > { %666 = vmatpush3.bf16.msra.mxu1 %v665_v22  ;;  %643 = vmatprep.subr.bf16.mxu0 %v851_v5  ;;  %v414_v44 = vshrl.u32 %v413_v43, 7 }
  0x48   : > { %667 = vmatprep.subr.bf16.mxu1 %v851_v5 }
  0x4a   : > { %645 = vmatpush3.bf16.msra.mxu0 %v644_v27 }
  0x4b   : > { %669 = vmatpush3.bf16.msra.mxu1 %v668_v28  ;;  %646 = vmatprep.subr.bf16.mxu0 %v851_v5 }
  0x4c   : > { %670 = vmatprep.subr.bf16.mxu1 %v851_v5 }
  0x4e   : > { %648 = vmatpush3.bf16.msra.mxu0 %v647_v33 }
  0x4f   : > { %672 = vmatpush3.bf16.msra.mxu1 %v671_v34  ;;  %649 = vmatprep.subr.bf16.mxu0 %v851_v5 }
  0x50   : > { %673 = vmatprep.subr.bf16.mxu1 %v851_v5 }
  0x52   : > { %651 = vmatpush3.bf16.msra.mxu0 %v650_v39 }
  0x53   : > { %675 = vmatpush3.bf16.msra.mxu1 %v674_v40  ;;  %652 = vmatprep.subr.bf16.mxu0 %v851_v5 }
  0x54   : > { %676 = vmatprep.subr.bf16.mxu1 %v851_v5 }
  0x56   : > { %654 = vmatpush3.bf16.msra.mxu0 %v653_v45  ;;  %v86_v45 = vld [vmem:[%s85_s19] sm:$0x1] }
  0x57   : > { %678 = vmatpush3.bf16.msra.mxu1 %v677_v46  ;;  %655 = vmatprep.subr.bf16.mxu0 %v851_v5  ;;  %vm261_vm1 = vcmp.ne.f32.partialorder %v86_v45, 0.0  ;;  %v415_v46 = vsub.s32 0, %v414_v44  ;;  %v313_v44 = vmul.f32 %v1037_v49, %v1010_v42 }
  0x58   : > { %679 = vmatprep.subr.bf16.mxu1 %v851_v5 }
  0x5a   : > { %657 = vmatpush3.bf16.msra.mxu0 %v656_v51 }
  0x5b   : > { %681 = vmatpush3.bf16.msra.mxu1 %v680_v52 }
  0x5d   : > { %597 = vmatmul.mubr.f32.vlgmr.msra.gmra.mrb[0].mxu0 %v842_v1 }
  0x5e   : > { %632 = vmatmul.mubr.f32.vlgmr.msra.gmra.mrb[0].mxu1 %v842_v1 }
  0x64   : > { %708 = vset.pattern.permute.xlu0 %v854_v20 }
  0xbb   : > { %v282_v54 = vpop.trf.xlu0 }
  0xbc   : > { %v317_v55 = vmul.f32 %v316_v53, %v282_v54 }
  0xbe   : > { %335 = vperm.xlu0 %708, %v317_v55   ;;  %v301_v55 = vmul.f32 %v1037_v49, %v962_v3 }
  0xbf   : > { %v283_v56 = vpop.trf.xlu0 }
  0xc0   : > { %v318_v57 = vmul.f32 %v316_v53, %v283_v56 }
  0xc2   : > { %340 = vperm.xlu1 %709, %v318_v57  }
  0xc3   : > { %v284_v58 = vpop.trf.xlu0 }
  0xc4   : > { %v319_v59 = vmul.f32 %v316_v53, %v284_v58 }
  0xc6   : > { %345 = vperm.xlu1 %709, %v319_v59  }
  0xc7   : > { %v285_v60 = vpop.trf.xlu0 }
  0xc8   : > { %v320_v61 = vmul.f32 %v316_v53, %v285_v60 }
  0xca   : > { %350 = vperm.xlu1 %709, %v320_v61   ;;  %v302_v61 = vmul.f32 %v1037_v49, %v968_v8 }
  0xcb   : > { %v286_v62 = vpop.trf.xlu0 }
  0xcc   : > { %v321_v63 = vmul.f32 %v316_v53, %v286_v62 }
  0xce   : > { %355 = vperm.xlu1 %709, %v321_v63  }
  0xcf   : > { %v287_v0 = vpop.trf.xlu0 }
  0xd0   : > { %v322_v1 = vmul.f32 %v316_v53, %v287_v0  ;;  %v303_v0 = vmul.f32 %v1037_v49, %v970_v9 }
  0xd2   : > { %360 = vperm.xlu1 %709, %v322_v1  }
  0xd3   : > { %v288_v4 = vpop.trf.xlu0 }
  0xd4   : > { %v323_v5 = vmul.f32 %v316_v53, %v288_v4 }
  0xd6   : > { %365 = vperm.xlu1 %709, %v323_v5   ;;  %v304_v5 = vmul.f32 %v1037_v49, %v976_v16 }
  0xd7   : > { %v289_v6 = vpop.trf.xlu0 }
  0xd8   : > { %v324_v7 = vmul.f32 %v316_v53, %v289_v6 }
  0xda   : > { %370 = vperm.xlu1 %709, %v324_v7  }
  0xdb   : > { %v290_v10 = vpop.trf.xlu0 }
  0xdc   : > { %v325_v11 = vmul.f32 %v316_v53, %v290_v10  ;;  %v305_v10 = vmul.f32 %v1037_v49, %v978_v17 }
  0xde   : > { %375 = vperm.xlu1 %709, %v325_v11  }
  0xdf   : > { %v291_v12 = vpop.trf.xlu0 }
  0xe0   : > { %v326_v13 = vmul.f32 %v316_v53, %v291_v12 }
  0xe2   : > { %380 = vperm.xlu1 %709, %v326_v13   ;;  %v306_v13 = vmul.f32 %v1037_v49, %v984_v23 }
  0xe3   : > { %v292_v14 = vpop.trf.xlu0 }
  0xe4   : > { %v327_v15 = vmul.f32 %v316_v53, %v292_v14 }
  0xe6   : > { %385 = vperm.xlu1 %709, %v327_v15  }
  0xe7   : > { %v293_v18 = vpop.trf.xlu0 }
  0xe8   : > { %v328_v19 = vmul.f32 %v316_v53, %v293_v18  ;;  %v307_v18 = vmul.f32 %v1037_v49, %v986_v24 }
  0xea   : > { %390 = vperm.xlu1 %709, %v328_v19  }
  0xeb   : > { %v294_v20 = vpop.trf.xlu0 }
  0xec   : > { %v329_v21 = vmul.f32 %v316_v53, %v294_v20 }
  0xee   : > { %395 = vperm.xlu1 %709, %v329_v21   ;;  %v308_v21 = vmul.f32 %v1037_v49, %v992_v29 }
  0xef   : > { %v295_v22 = vpop.trf.xlu0 }
  0xf0   : > { %v330_v25 = vmul.f32 %v316_v53, %v295_v22 }
  0xf2   : > { %400 = vperm.xlu1 %709, %v330_v25  }
  0xf3   : > { %v296_v26 = vpop.trf.xlu0 }
  0xf4   : > { %v331_v27 = vmul.f32 %v316_v53, %v296_v26  ;;  %v309_v26 = vmul.f32 %v1037_v49, %v994_v30 }
  0xf6   : > { %405 = vperm.xlu1 %709, %v331_v27  }
  0xf7   : > { %v297_v28 = vpop.trf.xlu0 }
  0xf8   : > { %v332_v31 = vmul.f32 %v316_v53, %v297_v28  ;;  %v300_v53 = vmul.f32 %v1037_v49, %v960_v2 }
  0xfa   : > { %410 = vperm.xlu1 %709, %v332_v31   ;;  %v310_v31 = vmul.f32 %v1037_v49, %v1000_v35 }
 0x130   : > { %v185_v33 = vpop.f32.mrb[0].mxu0 }
 0x131   : > { %v190_v34 = vmul.f32 %v189_v32, %v185_v33  ;;  %v257_v37 = vpop.f32.mrb[0].mxu1  ;;  %v598_v38 = vpop.f32.mrb[1].mxu0 }
 0x132   : > { %v633_v39 = vpop.f32.mrb[1].mxu1 }
 0x133   : > { %v258_v40 = vadd.f32 %v257_v37, %v190_v34  ;;  %v311_v34 = vmul.f32 %v1037_v49, %v1002_v36  ;;  %v312_v39 = vmul.f32 %v1037_v49, %v1008_v41 }
 0x135   : > { %710 = vtanh.f32 %v258_v40 }
 0x13d   : > { %v336_v54 = vpop.permute.xlu0 %335 }
 0x13f   : > { %v711_v50 = vpop.eup %710 }
 0x140   : > { %v1039_v1 = vsel %vm261_vm1, %v86_v45, %v711_v50   ;;  %v314_v50 = vmul.f32 %v1037_v49, %v1016_v47 }
 0x141   : > { %v1137_v51 = vmov %v1039_v1  ;;  %v341_v57 = vpop.permute.xlu1 %340 }
 0x142   : > { %265 = vst [vmem:[%s264_s23] sm:$0x1] %v1137_v51  ;;  %v1044_v52 = vrot.slane %v1137_v51, %v415_v46  ;;  %465 = vst [vmem:[#allocation2] sm:$0x1] (%p80_p10), %v1137_v51 }
 0x144   : > { %v417_v56 = vmul.f32 %v1044_v52, %v336_v54  ;;  %v418_v58 = vmul.f32 %v1044_v52, %v341_v57 }
 0x145   : > { %v346_v62 = vpop.permute.xlu1 %345 }
 0x146   : > { %v433_v59 = vadd.f32 %v417_v56, %v300_v53  ;;  %v434_v60 = vadd.f32 %v418_v58, %v301_v55  ;;  %v419_v63 = vmul.f32 %v1044_v52, %v346_v62  ;;  %v315_v55 = vmul.f32 %v1037_v49, %v1018_v48 }
 0x148   : > { %449 = vst [vmem:[#allocation11] sm:$0xff] %v433_v59  ;;  %450 = vst [vmem:[#allocation11 + $0x8] sm:$0xff] %v434_v60  ;;  %v435_v2 = vadd.f32 %v419_v63, %v302_v61 }
 0x149   : > { %v351_v3 = vpop.permute.xlu1 %350 }
 0x14a   : > { %451 = vst [vmem:[#allocation11 + $0x10] sm:$0xff] %v435_v2  ;;  %v420_v1 = vmul.f32 %v1044_v52, %v351_v3 }
 0x14c   : > { %v436_v4 = vadd.f32 %v420_v1, %v303_v0  ;;  %v1138_v1 = vmov %v1137_v51 }
 0x14d   : > { %v356_v6 = vpop.permute.xlu1 %355 }
 0x14e   : > { %452 = vst [vmem:[#allocation11 + $0x18] sm:$0xff] %v436_v4  ;;  %v421_v8 = vmul.f32 %v1044_v52, %v356_v6 }
 0x150   : > { %v437_v7 = vadd.f32 %v421_v8, %v304_v5 }
 0x151   : > { %v361_v11 = vpop.permute.xlu1 %360 }
 0x152   : > { %453 = vst [vmem:[#allocation11 + $0x20] sm:$0xff] %v437_v7  ;;  %v422_v9 = vmul.f32 %v1044_v52, %v361_v11 }
 0x154   : > { %v438_v12 = vadd.f32 %v422_v9, %v305_v10 }
 0x155   : > { %v366_v14 = vpop.permute.xlu1 %365 }
 0x156   : > { %454 = vst [vmem:[#allocation11 + $0x28] sm:$0xff] %v438_v12  ;;  %v423_v16 = vmul.f32 %v1044_v52, %v366_v14 }
 0x158   : > { %v439_v15 = vadd.f32 %v423_v16, %v306_v13 }
 0x159   : > { %v371_v19 = vpop.permute.xlu1 %370 }
 0x15a   : > { %455 = vst [vmem:[#allocation11 + $0x30] sm:$0xff] %v439_v15  ;;  %v424_v17 = vmul.f32 %v1044_v52, %v371_v19 }
 0x15c   : > { %v440_v20 = vadd.f32 %v424_v17, %v307_v18 }
 0x15d   : > { %v376_v22 = vpop.permute.xlu1 %375 }
 0x15e   : > { %456 = vst [vmem:[#allocation11 + $0x38] sm:$0xff] %v440_v20  ;;  %v425_v23 = vmul.f32 %v1044_v52, %v376_v22 }
 0x160   : > { %v441_v25 = vadd.f32 %v425_v23, %v308_v21 }
 0x161   : > { %v381_v27 = vpop.permute.xlu1 %380 }
 0x162   : > { %457 = vst [vmem:[#allocation11 + $0x40] sm:$0xff] %v441_v25  ;;  %v426_v24 = vmul.f32 %v1044_v52, %v381_v27 }
 0x164   : > { %v442_v28 = vadd.f32 %v426_v24, %v309_v26 }
 0x165   : > { %v386_v32 = vpop.permute.xlu1 %385 }
 0x166   : > { %458 = vst [vmem:[#allocation11 + $0x48] sm:$0xff] %v442_v28  ;;  %v427_v29 = vmul.f32 %v1044_v52, %v386_v32 }
 0x168   : > { %v443_v33 = vadd.f32 %v427_v29, %v310_v31 }
 0x169   : > { %v391_v37 = vpop.permute.xlu1 %390 }
 0x16a   : > { %459 = vst [vmem:[#allocation11 + $0x50] sm:$0xff] %v443_v33  ;;  %v428_v30 = vmul.f32 %v1044_v52, %v391_v37 }
 0x16c   : > { %v444_v38 = vadd.f32 %v428_v30, %v311_v34 }
 0x16d   : > { %v396_v40 = vpop.permute.xlu1 %395 }
 0x16e   : > { %460 = vst [vmem:[#allocation11 + $0x58] sm:$0xff] %v444_v38  ;;  %v429_v35 = vmul.f32 %v1044_v52, %v396_v40 }
 0x170   : > { %v445_v43 = vadd.f32 %v429_v35, %v312_v39 }
 0x171   : > { %v401_v45 = vpop.permute.xlu1 %400 }
 0x172   : > { %461 = vst [vmem:[#allocation11 + $0x60] sm:$0xff] %v445_v43  ;;  %v430_v36 = vmul.f32 %v1044_v52, %v401_v45 }
 0x174   : > { %v446_v46 = vadd.f32 %v430_v36, %v313_v44 }
 0x175   : > { %v406_v53 = vpop.permute.xlu1 %405 }
 0x176   : > { %462 = vst [vmem:[#allocation11 + $0x68] sm:$0xff] %v446_v46  ;;  %v431_v41 = vmul.f32 %v1044_v52, %v406_v53 }
 0x178   : > { %v447_v54 = vadd.f32 %v431_v41, %v314_v50  ;;  %83 = sbr.rel (!%p80_p10) target bundleno = 59 (0x3b), region = 72 }
 0x179   : > { %v411_v56 = vpop.permute.xlu1 %410 }
 0x17a   : > { %463 = vst [vmem:[#allocation11 + $0x70] sm:$0xff] %v447_v54  ;;  %v432_v42 = vmul.f32 %v1044_v52, %v411_v56 }
 0x17c   : > { %v448_v57 = vadd.f32 %v432_v42, %v315_v55 }
 0x17e   : > { %464 = vst [vmem:[#allocation11 + $0x78] sm:$0xff] %v448_v57 }
 0x17f   :  { %789 = shalt.err (!%p786_p2)
}
 0x180   :  { %s790_s29 = scalar_lea.hbm %s1134_s6, 128 }
 0x181   :  { %p791_p3 = scmp.ne.s32.totalorder %s1134_s6, %s790_s29  ;;  %p794_p4 = scmp.lt.u32.totalorder %s790_s29, %s1134_s6 }
 0x183   :  { %p796_p5 = pnand %p794_p4, %p791_p3 }
 0x185   :  { %799 = shalt.err (!%p796_p5)
}
 0x186   :  { %475 = dma.vmem_to_hbm [thread:$0]  %s473_s25, 128, %s1134_s6, [#allocation9]  }
 0x187   :  { %811 = shalt.err (!%p925_p1)
}
 0x188   :  { %s812_s12 = scalar_lea.hbm %s1135_s7, 2048 }
 0x189   :  { %p813_p6 = scmp.ne.s32.totalorder %s1135_s7, %s812_s12  ;;  %p816_p7 = scmp.lt.u32.totalorder %s812_s12, %s1135_s7 }
 0x18b   :  { %p818_p8 = pnand %p816_p7, %p813_p6 }
 0x18d   :  { %821 = shalt.err (!%p818_p8)
}
 0x18e   :  { %s856_s5 = smov 128   ;;  %s857_s16 = smov 8  }
 0x18f   :  { %487 = dma.vmem_to_hbm [thread:$0]  %s910_s14, 2048, %s1135_s7, [#allocation12], %s856_s5, %s856_s5, %s857_s16  }
 0x190   :  { %836 = dma.done.wait [#allocation9], 128  }
 0x191   :  { %837 = vsyncadd [#allocation9], 4294967168 }
 0x192   :  { %838 = dma.done.wait [#allocation12], 2048  }
 0x193   :  { %839 = vsyncadd [#allocation12], 4294965248 }
 0x194   :  { %494 = vsyncpa [#allocation8], 1 }
 0x195   :  { %495 = vsyncpa [#allocation9], 1 }
 0x196   :  { %496 = vsyncpa [#allocation12], 1 }
 0x197   :  { %497 = vsyncmov [#allocation4] }
 0x19a   :  { %s498_s18 = vpop.sfrf %497 }
 0x19b   :  { %p527_p1 = scmp.ne.s32.totalorder %s498_s18, 0 }
 0x19d   :  { %502 = shalt.err (%p527_p1)  }
 0x19e   :  { %504 = vsyncmov [#allocation4 + $0x1] }
 0x1a1   :  { %s505_s19 = vpop.sfrf %504 }
 0x1a2   :  { %p528_p9 = scmp.ne.s32.totalorder %s505_s19, 0 }
 0x1a4   :  { %509 = shalt.err (%p528_p9)  }
 0x1a5   :  { %511 = vsyncmov [#allocation4 + $0x2] }
 0x1a8   :  { %s512_s20 = vpop.sfrf %511 }
 0x1a9   :  { %p529_p10 = scmp.ne.s32.totalorder %s512_s20, 0 }
 0x1ab   :  { %516 = shalt.err (%p529_p10)  }

</bundles_post_ra>
